<compile_context>
chip_gen: v7x
topology: tpu7x:2x2x1
jax: 0.10.0
libtpu: 0.0.40
codegen_flags: <defaults>
</compile_context>

<pallas_src>
import functools

import jax
import jax.numpy as jnp
from jax.experimental import pallas as pl
from jax.experimental.pallas import tpu as pltpu


def _round_up(x, m):
    return (x + m - 1) // m * m


def _pick_m_tile(m, target=512):
    """Largest multiple-of-8 tile <= target that divides M (else target; caller pads)."""
    if m <= target:
        return m
    tm = (target // 8) * 8
    while tm >= 8:
        if m % tm == 0:
            return tm
        tm -= 8
    return target


def _patch_embed_kernel(patches_ref, w_ref, b_ref, out_ref):
    # patches_ref: (TM, K) compute dtype; w_ref: (K, N) compute dtype;
    # b_ref: (1, N) f32; out_ref: (TM, N) out dtype.
    acc = jnp.dot(patches_ref[...], w_ref[...], preferred_element_type=jnp.float32)
    out_ref[...] = (acc + b_ref[...]).astype(out_ref.dtype)


def prepare_projection_params(weight, bias, compute_dtype=jnp.bfloat16):
    """Conv2d params (hidden, C, ph, pw), (hidden,) -> matmul operands (K, Np), (1, Np).

    In a real model call this once outside the jitted forward and reuse the result
    (avoids a per-call weight transpose).  Np = hidden rounded up to 128 so the
    kernel's output stores stay lane-dense.
    """
    hidden = weight.shape[0]
    k = weight.shape[1] * weight.shape[2] * weight.shape[3]
    n_pad = _round_up(hidden, 128)
    w_mat = weight.reshape(hidden, k).T.astype(compute_dtype)     # (K, hidden)
    b_mat = bias.astype(jnp.float32).reshape(1, hidden)
    if n_pad != hidden:
        w_mat = jnp.pad(w_mat, ((0, 0), (0, n_pad - hidden)))
        b_mat = jnp.pad(b_mat, ((0, 0), (0, n_pad - hidden)))
    return w_mat, b_mat


def deit_patch_embeddings(pixel_values, weight, bias, patch_size,
                          compute_dtype=jnp.bfloat16, m_tile=512):
    """pixel_values: (B, C, H, W) NCHW
       weight:       (hidden, C, ph, pw)  (PyTorch Conv2d layout)
       bias:         (hidden,)
       returns:      (B, num_patches, hidden)
    """
    B, C, H, W = pixel_values.shape
    hidden = weight.shape[0]
    ph, pw = patch_size
    assert C == weight.shape[1], "channel mismatch with projection weight"
    assert H % ph == 0 and W % pw == 0, "image size must be divisible by patch size"
    Hp, Wp = H // ph, W // pw
    num_patches = Hp * Wp
    K = C * ph * pw
    M = B * num_patches
    out_dtype = pixel_values.dtype

    # ---- glue: patch extraction (single fused XLA transpose + cast to compute dtype) ----
    # (B, C, Hp, ph, Wp, pw) -> (B, Hp, Wp, C, ph, pw) -> (M, K)
    x = pixel_values.reshape(B, C, Hp, ph, Wp, pw)
    x = jnp.transpose(x, (0, 2, 4, 1, 3, 5)).astype(compute_dtype)
    patches = x.reshape(M, K)

    # ---- projection params as matmul operands (hoistable in a real model) ----
    w_mat, b_mat = prepare_projection_params(weight, bias, compute_dtype)
    N = w_mat.shape[1]                                   # hidden padded to mult of 128

    # ---- M tiling ----
    TM = _pick_m_tile(M, m_tile)
    Mp = _round_up(M, TM)
    if Mp != M:  # rare corner case: no nice divisor; pad (zeros) and slice after
        patches = jnp.pad(patches, ((0, Mp - M), (0, 0)))

    grid = (Mp // TM,)
    itemsize_in = jnp.dtype(compute_dtype).itemsize
    itemsize_out = jnp.dtype(out_dtype).itemsize
    cost = pl.CostEstimate(
        flops=2 * Mp * K * N,
        transcendentals=0,
        bytes_accessed=Mp * K * itemsize_in + K * N * itemsize_in + Mp * N * itemsize_out,
    )

    out = pl.pallas_call(
        _patch_embed_kernel,
        out_shape=jax.ShapeDtypeStruct((Mp, N), out_dtype),
        grid=grid,
        in_specs=[
            pl.BlockSpec((TM, K), lambda i: (i, 0)),   # streamed over M
            pl.BlockSpec((K, N), lambda i: (0, 0)),    # weight, resident
            pl.BlockSpec((1, N), lambda i: (0, 0)),    # bias, resident
        ],
        out_specs=pl.BlockSpec((TM, N), lambda i: (i, 0)),
        compiler_params=pltpu.CompilerParams(
            dimension_semantics=("parallel",),         # megacore-shardable on v7x
            vmem_limit_bytes=64 * 1024 * 1024,
        ),
        cost_estimate=cost,
    )(patches, w_mat, b_mat)

    out = out[:M, :hidden].reshape(B, num_patches, hidden)
    return out


if __name__ == "__main__":
    # Small DeiT-like config: image 16x16, patch 4x4, 4 channels, hidden 32
    B, C, H, W = 2, 4, 16, 16
    ph, pw = 4, 4
    hidden = 32

    key = jax.random.PRNGKey(0)
    k_x, k_w, k_b = jax.random.split(key, 3)
    pixel_values = jax.random.normal(k_x, (B, C, H, W), dtype=jnp.float32)
    weight = jax.random.normal(k_w, (hidden, C, ph, pw), dtype=jnp.float32) * 0.02
    bias = jax.random.normal(k_b, (hidden,), dtype=jnp.float32) * 0.02

    # Default (performance) path: bf16 MXU compute, f32 accumulation.
    fwd = jax.jit(functools.partial(deit_patch_embeddings, patch_size=(ph, pw)))
    out = jax.block_until_ready(fwd(pixel_values, weight, bias))

    # Exact-semantics path (f32 compute) for a tight numerical check.
    out_f32 = jax.block_until_ready(
        deit_patch_embeddings(pixel_values, weight, bias, (ph, pw),
                              compute_dtype=jnp.float32))

    # Reference: plain-JAX strided conv (matches the PyTorch forward semantics).
    ref = jax.lax.conv_general_dilated(
        pixel_values, weight, window_strides=(ph, pw), padding="VALID",
        dimension_numbers=("NCHW", "OIHW", "NCHW"))
    ref = ref + bias.reshape(1, hidden, 1, 1)
    ref = ref.reshape(B, hidden, -1).transpose(0, 2, 1)   # flatten(2).transpose(1,2)

    assert out.shape == (B, (H // ph) * (W // pw), hidden)
    assert out_f32.shape == out.shape
    assert jnp.allclose(out_f32, ref, atol=1e-4, rtol=1e-4)   # f32 path: tight
    assert jnp.allclose(out, ref, atol=1e-2, rtol=1e-2)       # bf16 MXU path: loose

    print("KERNEL_OK")
</pallas_src>

<mosaic_0001>
module attributes {stable_mosaic.version = 11 : i64} {
  func.func @_patch_embed_kernel(%arg0: i32, %arg1: memref<32x64xbf16, #tpu.memory_space<vmem>>, %arg2: memref<64x128xbf16, #tpu.memory_space<vmem>>, %arg3: memref<1x128xf32, #tpu.memory_space<vmem>>, %arg4: memref<32x128xf32, #tpu.memory_space<vmem>>) attributes {dimension_semantics = [#tpu.dimension_semantics<parallel>], iteration_bounds = array<i64: 1>, scalar_prefetch = 0 : i64, scratch_operands = 0 : i64, tpu.core_type = #tpu.core_type<tc>, window_params = [{transform_indices = @transform_0, window_bounds = array<i64: 32, 64>}, {pipeline_mode = #tpu.pipeline_mode<synchronous>, transform_indices = @transform_1, window_bounds = array<i64: 64, 128>}, {pipeline_mode = #tpu.pipeline_mode<synchronous>, transform_indices = @transform_2, window_bounds = array<i64: 1, 128>}, {transform_indices = @transform_3, window_bounds = array<i64: 32, 128>}]} {
    %c0 = arith.constant 0 : index
    %c0_0 = arith.constant 0 : index
    %0 = vector.load %arg1[%c0, %c0_0] : memref<32x64xbf16, #tpu.memory_space<vmem>>, vector<32x64xbf16>
    %c0_1 = arith.constant 0 : index
    %c0_2 = arith.constant 0 : index
    %1 = vector.load %arg2[%c0_1, %c0_2] : memref<64x128xbf16, #tpu.memory_space<vmem>>, vector<64x128xbf16>
    %cst = arith.constant dense<0.000000e+00> : vector<32x128xf32>
    %2 = tpu.matmul %0, %1, %cst {dimension_numbers = #tpu.dot_dimension_numbers<[1], [0], [0], [1], [0, 0, 1, 1], [], []>} : vector<32x64xbf16>, vector<64x128xbf16>, vector<32x128xf32> -> vector<32x128xf32>
    %c0_3 = arith.constant 0 : index
    %c0_4 = arith.constant 0 : index
    %3 = vector.load %arg3[%c0_3, %c0_4] : memref<1x128xf32, #tpu.memory_space<vmem>>, vector<1x128xf32>
    %4 = vector.broadcast %3 : vector<1x128xf32> to vector<32x128xf32>
    %5 = arith.addf %2, %4 : vector<32x128xf32>
    %c0_5 = arith.constant 0 : index
    %c0_6 = arith.constant 0 : index
    %6 = vector.load %arg4[%c0_5, %c0_6] : memref<32x128xf32, #tpu.memory_space<vmem>>, vector<32x128xf32>
    tpu.vector_store %arg4[%c0_5, %c0_6], %5 {strides = array<i32>} : memref<32x128xf32, #tpu.memory_space<vmem>>, vector<32x128xf32>,
    return
  }
  func.func @transform_0(%arg0: i32) -> (i32, i32) {
    %c0_i32 = arith.constant 0 : i32
    %c0_i32_0 = arith.constant 0 : i32
    return %arg0, %c0_i32 : i32, i32
  }
  func.func @transform_1(%arg0: i32) -> (i32, i32) {
    %c0_i32 = arith.constant 0 : i32
    %c0_i32_0 = arith.constant 0 : i32
    %c0_i32_1 = arith.constant 0 : i32
    return %c0_i32, %c0_i32_0 : i32, i32
  }
  func.func @transform_2(%arg0: i32) -> (i32, i32) {
    %c0_i32 = arith.constant 0 : i32
    %c0_i32_0 = arith.constant 0 : i32
    %c0_i32_1 = arith.constant 0 : i32
    return %c0_i32, %c0_i32_0 : i32, i32
  }
  func.func @transform_3(%arg0: i32) -> (i32, i32) {
    %c0_i32 = arith.constant 0 : i32
    %c0_i32_0 = arith.constant 0 : i32
    return %arg0, %c0_i32 : i32, i32
  }
}

</mosaic_0001>

<bundles_post_ra>
// kernel: deit_patch_embeddings.1
= control target key start
LH: loop header
LB: loop body
LE: loop exit
PB: predicated region body
PF: predicated region fallthrough
CT: control target
= control target key end

     0   :  { %8 = vsyncpa [#allocation3], 0  ;;  %s404_s0 = inlined_call_operand.hbm [shape: bf16[32,64], index: 0, kind: input, shape index: {}]   ;;  %s405_s1 = inlined_call_operand.hbm [shape: bf16[64,128], index: 1, kind: input, shape index: {}]   ;;  %s406_s2 = inlined_call_operand.hbm [shape: f32[1,128], index: 2, kind: input, shape index: {}]   ;;  %s407_s3 = inlined_call_operand.hbm [shape: f32[32,128], index: 3, kind: output, shape index: {}]  }
   0x1   :  { %9 = vsyncpa [#allocation6], 0 }
   0x2   :  { %10 = vsyncpa [#allocation4], 0  ;;  %s321_s12 = smov [#allocation5]   ;;  %s322_s14 = smov [#allocation2]  }
   0x3   :  { %s28_s13 = sshll.u32 %s321_s12, 4  ;;  %s16_s15 = sshll.u32 %s322_s14, 4  ;;  %s29_s13 = int_to_ptr.vmem [resolvable:$true] %s28_s13  ;;  %s349_s15 = int_to_ptr.vmem [resolvable:$true] %s16_s15 }
   0x4   :  { %s227_s18 = scalar_lea.hbm %s405_s1, 512 }
   0x5   :  { %p228_p0 = scmp.ne.s32.totalorder %s405_s1, %s227_s18  ;;  %p231_p1 = scmp.lt.u32.totalorder %s227_s18, %s405_s1 }
   0x7   :  { %p233_p2 = pnand %p231_p1, %p228_p0 }
   0x9   :  { %236 = shalt.err (!%p233_p2)
}
   0xa   :  { %s237_s23 = scalar_lea.vmem %s29_s13, 512  ;;  %p242_p4 = scmp.lt.s32.totalorder %s29_s13, %s29_s13 }
   0xb   :  { %p238_p3 = scmp.ne.s32.totalorder %s29_s13, %s237_s23  ;;  %p243_p5 = scmp.lt.s32.totalorder %s237_s23, %s237_s23 }
   0xd   :  { %p244_p6 = por %p243_p5, %p242_p4 }
   0xf   :  { %p245_p7 = pnand %p244_p6, %p238_p3 }
  0x11   :  { %248 = shalt.err (!%p245_p7)
}
  0x12   :  { %s323_s24 = smov 64   ;;  %s324_s25 = smov 4  }
  0x13   :  { %34 = dma.hbm_to_vmem [thread:$0]  %s405_s1, 512, %s29_s13, [#allocation6], %s323_s24, %s323_s24, %s324_s25  }
  0x14   :  { %s249_s30 = scalar_lea.hbm %s404_s0, 256 }
  0x15   :  { %p250_p8 = scmp.ne.s32.totalorder %s404_s0, %s249_s30  ;;  %p253_p9 = scmp.lt.u32.totalorder %s249_s30, %s404_s0 }
  0x17   :  { %p255_p10 = pnand %p253_p9, %p250_p8 }
  0x19   :  { %258 = shalt.err (!%p255_p10)
}
  0x1a   :  { %s259_s8 = scalar_lea.vmem %s349_s15, 256  ;;  %p264_p12 = scmp.lt.s32.totalorder %s349_s15, %s349_s15 }
  0x1b   :  { %p260_p11 = scmp.ne.s32.totalorder %s349_s15, %s259_s8  ;;  %p265_p13 = scmp.lt.s32.totalorder %s259_s8, %s259_s8 }
  0x1d   :  { %p266_p0 = por %p265_p13, %p264_p12 }
  0x1f   :  { %p267_p1 = pnand %p266_p0, %p260_p11 }
  0x21   :  { %270 = shalt.err (!%p267_p1)
}
  0x22   :  { %22 = dma.hbm_to_vmem [thread:$0]  %s404_s0, 256, %s349_s15, [#allocation3], %s323_s24, %s323_s24, %s324_s25  }
  0x23   :  { %s325_s10 = smov [#allocation7]   ;;  %s271_s14 = scalar_lea.hbm %s406_s2, 16 }
  0x24   :  { %s41_s11 = sshll.u32 %s325_s10, 4  ;;  %p272_p2 = scmp.ne.s32.totalorder %s406_s2, %s271_s14  ;;  %s42_s11 = int_to_ptr.vmem [resolvable:$true] %s41_s11 }
  0x25   :  { %p275_p3 = scmp.lt.u32.totalorder %s271_s14, %s406_s2 }
  0x27   :  { %p277_p4 = pnand %p275_p3, %p272_p2 }
  0x29   :  { %280 = shalt.err (!%p277_p4)
}
  0x2a   :  { %s281_s20 = scalar_lea.vmem %s42_s11, 16  ;;  %s285_s0 = scalar_lea.vmem %s42_s11, 32 }
  0x2b   :  { %p282_p5 = scmp.ne.s32.totalorder %s42_s11, %s281_s20  ;;  %p286_p6 = scmp.lt.s32.totalorder %s42_s11, %s42_s11 }
  0x2c   :  { %p287_p7 = scmp.lt.s32.totalorder %s285_s0, %s281_s20 }
  0x2e   :  { %p288_p8 = por %p287_p7, %p286_p6 }
  0x30   :  { %p289_p9 = pnand %p288_p8, %p282_p5 }
  0x32   :  { %292 = shalt.err (!%p289_p9)
}
  0x33   :  { %44 = dma.hbm_to_vmem [thread:$0]  %s406_s2, 16, %s42_s11, [#allocation6]  }
  0x34   :  { %315 = dma.done.wait [#allocation3], 256  }
  0x35   :  { %316 = vsyncadd [#allocation3], 4294967040 }
  0x36   :  { %317 = dma.done.wait [#allocation6], 528  }
  0x37   :  { %318 = vsyncadd [#allocation6], 4294966768  ;;  %v221_v0 = vld [vmem:[#allocation5] sm:$0xff]   ;;  %v222_v1 = vld [vmem:[#allocation5 + $0x8] sm:$0xff]   ;;  %vm108_vm0 = vcmask 523264   ;;  %s326_s2 = smov [#allocation8]  }
  0x38   :  { %201 = vmatprep.subr.bf16.mxu0 %v221_v0  ;;  %v223_v2 = vld [vmem:[#allocation5 + $0x10] sm:$0xff]   ;;  %v224_v4 = vld [vmem:[#allocation5 + $0x18] sm:$0xff]   ;;  %v186_v6 = vld [vmem:[#allocation7] ss:$0 sm:$0xff]  ;;  %s173_s22 = sshll.u32 %s326_s2, 4  ;;  %s174_s22 = int_to_ptr.vmem [resolvable:$true] %s173_s22 }
  0x39   :  { %202 = vmatpush3.bf16.msra.mxu0 %v221_v0  ;;  %v225_v3 = vld [vmem:[#allocation2] sm:$0xff]   ;;  %v226_v5 = vld [vmem:[#allocation2 + $0x8] sm:$0xff]   ;;  %s293_s23 = scalar_lea.vmem %s174_s22, 512  ;;  %p298_p11 = scmp.lt.s32.totalorder %s174_s22, %s174_s22 }
  0x3a   :  { %203 = vmatprep.subr.bf16.mxu0 %v222_v1  ;;  %209 = vmatprep.mubr.msk.bf16.mxu0 %vm108_vm0, %v225_v3  ;;  %p294_p10 = scmp.ne.s32.totalorder %s174_s22, %s293_s23  ;;  %p299_p12 = scmp.lt.s32.totalorder %s293_s23, %s293_s23 }
  0x3c   :  { %p300_p13 = por %p299_p12, %p298_p11 }
  0x3d   :  { %204 = vmatpush3.bf16.msra.mxu0 %v222_v1 }
  0x3e   :  { %205 = vmatprep.subr.bf16.mxu0 %v223_v2  ;;  %p301_p0 = pnand %p300_p13, %p294_p10 }
  0x41   :  { %206 = vmatpush3.bf16.msra.mxu0 %v223_v2 }
  0x42   :  { %207 = vmatprep.subr.bf16.mxu0 %v224_v4 }
  0x45   :  { %208 = vmatpush3.bf16.msra.mxu0 %v224_v4 }
  0x48   :  { %210 = vmatmul.mubr.msk.bf16.vlgmr.msra.gmra.mrb[0].mxu0 %vm108_vm0, %v226_v5 }
 0x11b   :  { %v211_v7 = vpop.f32.mrb[0].mxu0 }
 0x11c   :  { %v158_v8 = vadd.f32 %v211_v7, %v186_v6  ;;  %v149_v9 = vpop.f32.mrb[1].mxu0 }
 0x11d   :  { %v150_v10 = vadd.f32 %v186_v6, %v149_v9  ;;  %v212_v11 = vpop.f32.mrb[2].mxu0 }
 0x11e   :  { %166 = vst [vmem:[#allocation8 + $0x10] sm:$0xff] %v158_v8  ;;  %v161_v12 = vadd.f32 %v212_v11, %v186_v6  ;;  %v152_v13 = vpop.f32.mrb[3].mxu0 }
 0x11f   :  { %164 = vst [vmem:[#allocation8] sm:$0xff] %v150_v10  ;;  %v153_v14 = vadd.f32 %v186_v6, %v152_v13 }
 0x120   :  { %167 = vst [vmem:[#allocation8 + $0x18] sm:$0xff] %v161_v12 }
 0x121   :  { %165 = vst [vmem:[#allocation8 + $0x8] sm:$0xff] %v153_v14 }
 0x122   :  { %304 = shalt.err (!%p301_p0)
}
 0x123   :  { %s305_s26 = scalar_lea.hbm %s407_s3, 512 }
 0x124   :  { %p306_p1 = scmp.ne.s32.totalorder %s407_s3, %s305_s26  ;;  %p309_p2 = scmp.lt.u32.totalorder %s305_s26, %s407_s3 }
 0x126   :  { %p311_p3 = pnand %p309_p2, %p306_p1 }
 0x128   :  { %314 = shalt.err (!%p311_p3)
}
 0x129   :  { %s327_s4 = smov 128   ;;  %s328_s5 = smov 8  }
 0x12a   :  { %179 = dma.vmem_to_hbm [thread:$0]  %s174_s22, 512, %s407_s3, [#allocation4], %s327_s4, %s327_s4, %s328_s5  }
 0x12b   :  { %319 = dma.done.wait [#allocation4], 512  }
 0x12c   :  { %320 = vsyncadd [#allocation4], 4294966784 }
 0x12d   :  { %183 = vsyncpa [#allocation3], 1 }
 0x12e   :  { %184 = vsyncpa [#allocation6], 1 }
 0x12f   :  { %185 = vsyncpa [#allocation4], 1 }

</bundles_post_ra>
